<compile_context>
chip_gen: v5e
topology: v5e:2x2
jax: 0.10.0
libtpu: 0.0.40
codegen_flags: <defaults>
</compile_context>

<pallas_src>
import functools

import jax
import jax.numpy as jnp
from jax import lax
from jax.experimental import pallas as pl
from jax.experimental.pallas import tpu as pltpu


def _round_up(x, m):
    return ((x + m - 1) // m) * m


def mlp_kernel(x_ref, w1_ref, b1_ref, w23_ref, b23_ref, slab_ref, h_acc,
               *, out_sz, in_sz):
    """Grid = (batch_tiles, k_tiles). k (input_size) is the reduction axis of
    the first matmul; the fused head matmul + epilogue run on the last k."""
    k = pl.program_id(1)

    @pl.when(k == 0)
    def _init():
        h_acc[...] = jnp.zeros_like(h_acc)

    # First layer partial: (tm, tk) @ (tk, hid), f32 accumulation on the MXU.
    h_acc[...] += jnp.dot(x_ref[...], w1_ref[...],
                          preferred_element_type=jnp.float32)

    @pl.when(k == pl.num_programs(1) - 1)
    def _finalize():
        # Epilogue in f32 (VPU-friendly on v5e): bias + ReLU.
        h = jnp.maximum(h_acc[...] + b1_ref[...], 0.0)
        # TODO(synk): dropout would be applied here in training mode.

        # Fused heads: one lane-dense matmul producing [y | x_hat_logits | pad].
        z = jnp.dot(h.astype(w23_ref.dtype), w23_ref[...],
                    preferred_element_type=jnp.float32)
        z = z + b23_ref[...]

        # Sigmoid only on the reconstruction columns (EUP is idle here, so the
        # transcendental is effectively free; select on the VPU).
        col = lax.broadcasted_iota(jnp.int32, z.shape, 1)
        z = jnp.where(col >= out_sz, jax.nn.sigmoid(z), z)
        slab_ref[...] = z.astype(slab_ref.dtype)


def prepare_params(w1, b1, w2, b2, w3, b3, *, mxu_dtype=jnp.bfloat16,
                   tk_max=512):
    """One-time weight packing (call once, outside the hot forward path):
    transpose to (in, out) layout, fuse the two heads, pad to lane-dense
    multiples of 128, pad the reduction dim to the K tile, cast to bf16."""
    hid, in_sz = w1.shape
    out_sz = w2.shape[0]

    # K (input_size) tiling for the first matmul.
    if in_sz <= tk_max:
        tk, k_pad = in_sz, in_sz
    else:
        tk = tk_max
        k_pad = _round_up(in_sz, tk)

    w1t = jnp.pad(w1.T, ((0, k_pad - in_sz), (0, 0))).astype(mxu_dtype)

    # Fused head weight [W2.T | W3.T], padded to a multiple of 128 lanes.
    n_fused = out_sz + in_sz
    n_pad = _round_up(n_fused, 128)
    w23 = jnp.concatenate([w2.T, w3.T], axis=1)
    w23 = jnp.pad(w23, ((0, 0), (0, n_pad - n_fused))).astype(mxu_dtype)

    b1r = b1.reshape(1, hid).astype(jnp.float32)
    b23 = jnp.pad(jnp.concatenate([b2, b3]).reshape(1, n_fused),
                  ((0, 0), (0, n_pad - n_fused))).astype(jnp.float32)

    return dict(w1t=w1t, b1=b1r, w23=w23, b23=b23,
                in_sz=in_sz, out_sz=out_sz, hid=hid,
                tk=tk, k_pad=k_pad, n_pad=n_pad)


def mlp_forward(x, params, *, tm_max=128):
    """x: (B, input_size). Returns (y, x_hat) matching the PyTorch module."""
    p = params
    B, in_sz = x.shape
    assert in_sz == p["in_sz"]
    hid, n_pad = p["hid"], p["n_pad"]
    tk, k_pad = p["tk"], p["k_pad"]
    out_sz = p["out_sz"]
    mxu_dtype = p["w1t"].dtype

    # Batch tiling (bf16 sublane granularity is 16 for partial tiles).
    if B <= tm_max:
        tm, b_pad = B, B
    else:
        tm = tm_max
        b_pad = _round_up(B, tm)

    xq = x.astype(mxu_dtype)
    if (b_pad, k_pad) != (B, in_sz):
        xq = jnp.pad(xq, ((0, b_pad - B), (0, k_pad - in_sz)))

    grid = (b_pad // tm, k_pad // tk)

    kernel = functools.partial(mlp_kernel, out_sz=out_sz, in_sz=in_sz)

    slab = pl.pallas_call(
        kernel,
        out_shape=jax.ShapeDtypeStruct((b_pad, n_pad), jnp.float32),
        grid=grid,
        in_specs=[
            pl.BlockSpec((tm, tk), lambda i, k: (i, k)),     # x tile
            pl.BlockSpec((tk, hid), lambda i, k: (k, 0)),    # W1t K-slice
            pl.BlockSpec((1, hid), lambda i, k: (0, 0)),     # b1 (resident)
            pl.BlockSpec((hid, n_pad), lambda i, k: (0, 0)),  # fused W23
            pl.BlockSpec((1, n_pad), lambda i, k: (0, 0)),   # fused b23
        ],
        out_specs=pl.BlockSpec((tm, n_pad), lambda i, k: (i, 0)),
        scratch_shapes=[pltpu.VMEM((tm, hid), jnp.float32)],  # hidden accum
        compiler_params=pltpu.CompilerParams(
            dimension_semantics=("parallel", "arbitrary"),
            vmem_limit_bytes=48 * 1024 * 1024,   # fits v7x's 64 MiB VMEM
        ),
    )(xq, p["w1t"], p["b1"], p["w23"], p["b23"])

    # Split the lane-dense slab back into the two heads (cheap wrapper slices).
    y = slab[:B, :out_sz]
    x_hat = slab[:B, out_sz:out_sz + in_sz]
    return y, x_hat


def _init_linear(key, out_features, in_features, dtype=jnp.float32):
    # Deterministic init mimicking nn.Linear (uniform in +/- 1/sqrt(in)).
    kw, kb = jax.random.split(key)
    bound = 1.0 / (in_features ** 0.5)
    w = jax.random.uniform(kw, (out_features, in_features), dtype,
                           minval=-bound, maxval=bound)
    b = jax.random.uniform(kb, (out_features,), dtype,
                           minval=-bound, maxval=bound)
    return w, b


if __name__ == "__main__":
    input_size, hidden_size, output_size = 32, 64, 16
    batch = 16   # >= 16 keeps bf16 sublane tiling happy

    key = jax.random.PRNGKey(0)
    kx, k1, k2, k3 = jax.random.split(key, 4)

    x = jax.random.normal(kx, (batch, input_size), jnp.float32)
    w1, b1 = _init_linear(k1, hidden_size, input_size)
    w2, b2 = _init_linear(k2, output_size, hidden_size)
    w3, b3 = _init_linear(k3, input_size, hidden_size)

    params = prepare_params(w1, b1, w2, b2, w3, b3)   # one-time packing
    y, x_hat = mlp_forward(x, params)
    jax.block_until_ready((y, x_hat))

    # Pure-JAX f32 reference (kernel uses bf16 matmul operands -> loose tol).
    h_ref = jnp.maximum(x @ w1.T + b1, 0.0)
    y_ref = h_ref @ w2.T + b2
    xhat_ref = jax.nn.sigmoid(h_ref @ w3.T + b3)
    assert y.shape == y_ref.shape and x_hat.shape == xhat_ref.shape
    assert jnp.allclose(y, y_ref, atol=2e-2, rtol=2e-2)
    assert jnp.allclose(x_hat, xhat_ref, atol=2e-2, rtol=2e-2)

    print("KERNEL_OK")
</pallas_src>

<mosaic_0001>
module attributes {stable_mosaic.version = 11 : i64} {
  func.func @mlp_kernel(%arg0: i32, %arg1: i32, %arg2: memref<16x32xbf16, #tpu.memory_space<vmem>>, %arg3: memref<32x64xbf16, #tpu.memory_space<vmem>>, %arg4: memref<1x64xf32, #tpu.memory_space<vmem>>, %arg5: memref<64x128xbf16, #tpu.memory_space<vmem>>, %arg6: memref<1x128xf32, #tpu.memory_space<vmem>>, %arg7: memref<16x128xf32, #tpu.memory_space<vmem>>, %arg8: memref<16x64xf32, #tpu.memory_space<vmem>>) attributes {dimension_semantics = [#tpu.dimension_semantics<parallel>, #tpu.dimension_semantics<arbitrary>], iteration_bounds = array<i64: 1, 1>, scalar_prefetch = 0 : i64, scratch_operands = 1 : i64, tpu.core_type = #tpu.core_type<tc>, window_params = [{transform_indices = @transform_0, window_bounds = array<i64: 16, 32>}, {transform_indices = @transform_1, window_bounds = array<i64: 32, 64>}, {pipeline_mode = #tpu.pipeline_mode<synchronous>, transform_indices = @transform_2, window_bounds = array<i64: 1, 64>}, {pipeline_mode = #tpu.pipeline_mode<synchronous>, transform_indices = @transform_3, window_bounds = array<i64: 64, 128>}, {pipeline_mode = #tpu.pipeline_mode<synchronous>, transform_indices = @transform_4, window_bounds = array<i64: 1, 128>}, {transform_indices = @transform_5, window_bounds = array<i64: 16, 128>}]} {
    %c0_i32 = arith.constant 0 : i32
    %0 = arith.cmpi eq, %arg1, %c0_i32 : i32
    %1 = arith.extui %0 : i1 to i32
    %c0_i32_0 = arith.constant 0 : i32
    %2 = arith.cmpi ne, %1, %c0_i32_0 : i32
    scf.if %2 {
      %cst_10 = arith.constant 0.000000e+00 : f32
      %12 = vector.broadcast %cst_10 : f32 to vector<16x64xf32>
      %c0_11 = arith.constant 0 : index
      %c0_12 = arith.constant 0 : index
      %13 = vector.load %arg8[%c0_11, %c0_12] : memref<16x64xf32, #tpu.memory_space<vmem>>, vector<16x64xf32>
      tpu.vector_store %arg8[%c0_11, %c0_12], %12 {strides = array<i32>} : memref<16x64xf32, #tpu.memory_space<vmem>>, vector<16x64xf32>,
    } else {
    }
    %c0 = arith.constant 0 : index
    %c0_1 = arith.constant 0 : index
    %3 = vector.load %arg8[%c0, %c0_1] : memref<16x64xf32, #tpu.memory_space<vmem>>, vector<16x64xf32>
    %c0_2 = arith.constant 0 : index
    %c0_3 = arith.constant 0 : index
    %4 = vector.load %arg2[%c0_2, %c0_3] : memref<16x32xbf16, #tpu.memory_space<vmem>>, vector<16x32xbf16>
    %c0_4 = arith.constant 0 : index
    %c0_5 = arith.constant 0 : index
    %5 = vector.load %arg3[%c0_4, %c0_5] : memref<32x64xbf16, #tpu.memory_space<vmem>>, vector<32x64xbf16>
    %cst = arith.constant dense<0.000000e+00> : vector<16x64xf32>
    %6 = tpu.matmul %4, %5, %cst {dimension_numbers = #tpu.dot_dimension_numbers<[1], [0], [0], [1], [0, 0, 1, 1], [], []>} : vector<16x32xbf16>, vector<32x64xbf16>, vector<16x64xf32> -> vector<16x64xf32>
    %7 = arith.addf %3, %6 : vector<16x64xf32>
    %c0_6 = arith.constant 0 : index
    %c0_7 = arith.constant 0 : index
    %8 = vector.load %arg8[%c0_6, %c0_7] : memref<16x64xf32, #tpu.memory_space<vmem>>, vector<16x64xf32>
    tpu.vector_store %arg8[%c0_6, %c0_7], %7 {strides = array<i32>} : memref<16x64xf32, #tpu.memory_space<vmem>>, vector<16x64xf32>,
    %c0_i32_8 = arith.constant 0 : i32
    %9 = arith.cmpi eq, %arg1, %c0_i32_8 : i32
    %10 = arith.extui %9 : i1 to i32
    %c0_i32_9 = arith.constant 0 : i32
    %11 = arith.cmpi ne, %10, %c0_i32_9 : i32
    scf.if %11 {
      %c0_10 = arith.constant 0 : index
      %c0_11 = arith.constant 0 : index
      %12 = vector.load %arg8[%c0_10, %c0_11] : memref<16x64xf32, #tpu.memory_space<vmem>>, vector<16x64xf32>
      %c0_12 = arith.constant 0 : index
      %c0_13 = arith.constant 0 : index
      %13 = vector.load %arg4[%c0_12, %c0_13] : memref<1x64xf32, #tpu.memory_space<vmem>>, vector<1x64xf32>
      %14 = vector.broadcast %13 : vector<1x64xf32> to vector<16x64xf32>
      %15 = arith.addf %12, %14 : vector<16x64xf32>
      %cst_14 = arith.constant 0.000000e+00 : f32
      %16 = vector.broadcast %cst_14 : f32 to vector<16x64xf32>
      %17 = arith.maximumf %15, %16 : vector<16x64xf32>
      %18 = arith.truncf %17 : vector<16x64xf32> to vector<16x64xbf16>
      %c0_15 = arith.constant 0 : index
      %c0_16 = arith.constant 0 : index
      %19 = vector.load %arg5[%c0_15, %c0_16] : memref<64x128xbf16, #tpu.memory_space<vmem>>, vector<64x128xbf16>
      %cst_17 = arith.constant dense<0.000000e+00> : vector<16x128xf32>
      %20 = tpu.matmul %18, %19, %cst_17 {dimension_numbers = #tpu.dot_dimension_numbers<[1], [0], [0], [1], [0, 0, 1, 1], [], []>} : vector<16x64xbf16>, vector<64x128xbf16>, vector<16x128xf32> -> vector<16x128xf32>
      %c0_18 = arith.constant 0 : index
      %c0_19 = arith.constant 0 : index
      %21 = vector.load %arg6[%c0_18, %c0_19] : memref<1x128xf32, #tpu.memory_space<vmem>>, vector<1x128xf32>
      %22 = vector.broadcast %21 : vector<1x128xf32> to vector<16x128xf32>
      %23 = arith.addf %20, %22 : vector<16x128xf32>
      %24 = tpu.iota {dimensions = array<i32: 1>} : vector<16x128xi32>
      %c16_i32 = arith.constant 16 : i32
      %25 = vector.broadcast %c16_i32 : i32 to vector<16x128xi32>
      %26 = arith.cmpi sge, %24, %25 : vector<16x128xi32>
      %27 = arith.negf %23 : vector<16x128xf32>
      %28 = math.exp %27 : vector<16x128xf32>
      %cst_20 = arith.constant 1.000000e+00 : f32
      %29 = vector.broadcast %cst_20 : f32 to vector<16x128xf32>
      %30 = arith.addf %29, %28 : vector<16x128xf32>
      %31 = arith.divf %29, %30 : vector<16x128xf32>
      %32 = arith.select %26, %31, %23 : vector<16x128xi1>, vector<16x128xf32>
      %c0_21 = arith.constant 0 : index
      %c0_22 = arith.constant 0 : index
      %33 = vector.load %arg7[%c0_21, %c0_22] : memref<16x128xf32, #tpu.memory_space<vmem>>, vector<16x128xf32>
      tpu.vector_store %arg7[%c0_21, %c0_22], %32 {strides = array<i32>} : memref<16x128xf32, #tpu.memory_space<vmem>>, vector<16x128xf32>,
    } else {
    }
    return
  }
  func.func @transform_0(%arg0: i32, %arg1: i32) -> (i32, i32) {
    %c0_i32 = arith.constant 0 : i32
    return %arg0, %arg1 : i32, i32
  }
  func.func @transform_1(%arg0: i32, %arg1: i32) -> (i32, i32) {
    %c0_i32 = arith.constant 0 : i32
    %c0_i32_0 = arith.constant 0 : i32
    return %arg1, %c0_i32 : i32, i32
  }
  func.func @transform_2(%arg0: i32, %arg1: i32) -> (i32, i32) {
    %c0_i32 = arith.constant 0 : i32
    %c0_i32_0 = arith.constant 0 : i32
    %c0_i32_1 = arith.constant 0 : i32
    return %c0_i32, %c0_i32_0 : i32, i32
  }
  func.func @transform_3(%arg0: i32, %arg1: i32) -> (i32, i32) {
    %c0_i32 = arith.constant 0 : i32
    %c0_i32_0 = arith.constant 0 : i32
    %c0_i32_1 = arith.constant 0 : i32
    return %c0_i32, %c0_i32_0 : i32, i32
  }
  func.func @transform_4(%arg0: i32, %arg1: i32) -> (i32, i32) {
    %c0_i32 = arith.constant 0 : i32
    %c0_i32_0 = arith.constant 0 : i32
    %c0_i32_1 = arith.constant 0 : i32
    return %c0_i32, %c0_i32_0 : i32, i32
  }
  func.func @transform_5(%arg0: i32, %arg1: i32) -> (i32, i32) {
    %c0_i32 = arith.constant 0 : i32
    %c0_i32_0 = arith.constant 0 : i32
    return %arg0, %c0_i32 : i32, i32
  }
}

</mosaic_0001>

<bundles_post_ra>
// kernel: tpu_custom_call.1
= control target key start
LH: loop header
LB: loop body
LE: loop exit
PB: predicated region body
PF: predicated region fallthrough
CT: control target
= control target key end

     0   :  { %10 = vsyncpa [#allocation4], 0  ;;  %s480_s0 = inlined_call_operand.hbm [shape: bf16[16,32], index: 0, kind: input, shape index: {}]   ;;  %s481_s1 = inlined_call_operand.hbm [shape: bf16[32,64], index: 1, kind: input, shape index: {}]   ;;  %s482_s2 = inlined_call_operand.vmem [shape: f32[1,64], index: 2, kind: input, shape index: {}]   ;;  %s483_s3 = inlined_call_operand.hbm [shape: bf16[64,128], index: 3, kind: input, shape index: {}]   ;;  %s484_s4 = inlined_call_operand.vmem [shape: f32[1,128], index: 4, kind: input, shape index: {}]   ;;  %s485_s5 = inlined_call_operand.hbm [shape: f32[16,128], index: 5, kind: output, shape index: {}]  }
   0x1   :  { %11 = vsyncpa [#allocation7], 0 }
   0x2   :  { %12 = vsyncpa [#allocation5], 0  ;;  %s30_s20 = sshll.u32 %s481_s1, 4  ;;  %s416_s21 = smov [#allocation6]   ;;  %s31_s20 = int_to_ptr.hbm [resolvable:$true] %s30_s20 }
   0x3   :  { %s32_s22 = sshll.u32 %s416_s21, 4  ;;  %s17_s25 = sshll.u32 %s480_s0, 4  ;;  %s33_s22 = int_to_ptr.vmem [resolvable:$true] %s32_s22  ;;  %s18_s25 = int_to_ptr.hbm [resolvable:$true] %s17_s25 }
   0x4   :  { %s417_s26 = smov 64   ;;  %s418_s27 = smov 4  }
   0x5   :  { %38 = dma.hbm_to_vmem [thread:$0]  %s31_s20, 256, %s33_s22, [#allocation7], %s417_s26, %s417_s26, %s418_s27  }
   0x6   :  { %s419_s28 = smov [#allocation3]   ;;  %s45_s7 = sshll.u32 %s483_s3, 4  ;;  %s46_s7 = int_to_ptr.hbm [resolvable:$true] %s45_s7 }
   0x7   :  { %s19_s29 = sshll.u32 %s419_s28, 4  ;;  %s420_s1 = smov [#allocation8]   ;;  %s20_s29 = int_to_ptr.vmem [resolvable:$true] %s19_s29 }
   0x8   :  { %25 = dma.hbm_to_vmem [thread:$0]  %s18_s25, 128, %s20_s29, [#allocation4], %s417_s26, %s417_s26, %s418_s27  }
   0x9   :  { %s47_s8 = sshll.u32 %s420_s1, 4  ;;  %s48_s8 = int_to_ptr.vmem [resolvable:$true] %s47_s8 }
   0xa   :  { %53 = dma.hbm_to_vmem [thread:$0]  %s46_s7, 512, %s48_s8, [#allocation7], %s417_s26, %s417_s26, %s418_s27  }
   0xb   :  { %410 = dma.done.wait [#allocation4], 128  }
   0xc   :  { %411 = vsyncadd [#allocation4], 4294967168 }
   0xd   :  { %412 = dma.done.wait [#allocation7], 768  }
   0xe   :  { %413 = vsyncadd [#allocation7], 4294966528  ;;  %vm73_vm0 = vcmask 523264   ;;  %v421_v0 = vmov 0.0   ;;  %v290_v1 = vld [vmem:[#allocation6 + $0x8] sm:$0xff]  ;;  %v289_v2 = vld [vmem:[#allocation6] sm:$0xff]  ;;  %v191_v33 = vlaneseq }
   0xf   :  { %74 = vst.msk [vmem:[#allocation2] sm:$0xff] %vm73_vm0, %v421_v0  ;;  %111 = vmatpush.bf16.msra.mxu0 %v290_v1  ;;  %v288_v3 = vld [vmem:[#allocation3] sm:$0xff]  ;;  %vm101_vm1 = vcmask 261120   ;;  %v294_v4 = vld [vmem:[#allocation8 + $0x18] sm:$0xff]  ;;  %v293_v5 = vld [vmem:[#allocation8 + $0x10] sm:$0xff]  ;;  %s242_s13 = sshll.u32 %s485_s5, 4  ;;  %s243_s13 = int_to_ptr.hbm [resolvable:$true] %s242_s13 }
  0x10   :  { %75 = vst.msk [vmem:[#allocation2 + $0x8] sm:$0xff] %vm73_vm0, %v421_v0  ;;  %181 = vmatpush.bf16.msra.mxu1 %v294_v4  ;;  %v292_v6 = vld [vmem:[#allocation8 + $0x8] sm:$0xff]  ;;  %v291_v7 = vld [vmem:[#allocation8] sm:$0xff]  ;;  %v304_v14 = vld [vmem:[%s482_s2] ss:$0 sm:$0xff]  ;;  %v192_v37 = vand.u32 127, %v191_v33 }
  0x11   :  { %v305_v22 = vld [vmem:[%s484_s4] ss:$0 sm:$0xff]  ;;  %s422_s2 = smov [#allocation9]   ;;  %s423_s14 = smov 128  }
  0x12   :  { %vm193_vm4 = vcmp.ge.s32.totalorder %v192_v37, 16  ;;  %s240_s4 = sshll.u32 %s422_s2, 4  ;;  %s424_s15 = smov 8   ;;  %s241_s4 = int_to_ptr.vmem [resolvable:$true] %s240_s4 }
  0x13   :  { %112 = vmatpush.bf16.msra.mxu0 %v289_v2 }
  0x14   :  { %182 = vmatpush.bf16.msra.mxu1 %v293_v5 }
  0x16   :  { %268 = vmatmul.msk.bf16.vlgmr.msra.gmra.mxu0 %vm101_vm1, %v288_v3  ;;  %v76_v8 = vld [vmem:[#allocation2] sm:$0xff] }
  0x17   :  { %v77_v11 = vld [vmem:[#allocation2 + $0x8] sm:$0xff] }
  0x18   :  { %183 = vmatpush.bf16.msra.mxu1 %v292_v6 }
  0x1c   :  { %184 = vmatpush.bf16.msra.mxu1 %v291_v7 }
  0x93   :  { %v114_v9 = vpop.f32.mrf.mxu0 }
  0x94   :  { %v119_v10 = vadd.f32 %v114_v9, %v76_v8 }
  0x96   :  { %122 = vst.msk [vmem:[#allocation2] sm:$0xff] %vm73_vm0, %v119_v10 }
  0x9b   :  { %v116_v12 = vpop.f32.mrf.mxu0 }
  0x9c   :  { %v120_v13 = vadd.f32 %v116_v12, %v77_v11 }
  0x9d   :  { %v127_v15 = vld [vmem:[#allocation2] sm:$0xff] }
  0x9e   :  { %123 = vst.msk [vmem:[#allocation2 + $0x8] sm:$0xff] %vm73_vm0, %v120_v13  ;;  %v133_v16 = vadd.f32 %v304_v14, %v127_v15 }
  0xa0   :  { %v135_v19 = vmax.f32 %v133_v16, 0.0 }
  0xa5   :  { %v128_v17 = vld [vmem:[#allocation2 + $0x8] sm:$0xff] }
  0xa6   :  { %v134_v18 = vadd.f32 %v304_v14, %v128_v17 }
  0xa8   :  { %v136_v20 = vmax.f32 %v134_v18, 0.0 }
  0xaa   :  { %v137_v21 = vpack.c.bf16 %v136_v20, %v135_v19 }
  0xac   :  { %285 = vmatmul.msk.bf16.vlgmr.msra.gmra.mxu1 %vm73_vm0, %v137_v21 }
 0x129   :  { %v186_v23 = vpop.f32.mrf.mxu1 }
 0x12a   :  { %v187_v24 = vadd.f32 %v305_v22, %v186_v23 }
 0x12c   :  { %v286_v25 = vmul.f32 -1.442695, %v187_v24 }
 0x12e   :  { %306 = vpow2.f32 %v286_v25 }
 0x131   :  { %v188_v26 = vpop.f32.mrf.mxu1 }
 0x132   :  { %v189_v27 = vadd.f32 %v305_v22, %v188_v26 }
 0x134   :  { %v307_v28 = vpop.eup %306  ;;  %v287_v29 = vmul.f32 -1.442695, %v189_v27 }
 0x135   :  { %v200_v30 = vadd.f32 1.0, %v307_v28 }
 0x136   :  { %308 = vpow2.f32 %v287_v29 }
 0x137   :  { %310 = vrcp.f32 %v200_v30  ;;  %v213_v38 = vand.u32 2147483648, %v200_v30  ;;  %v211_v40 = vand.u32 2147483647, %v200_v30  ;;  %vm207_vm3 = vweird.f32 %v200_v30 }
 0x139   :  { %v214_v43 = vor.u32 1.1754944e-38, %v213_v38  ;;  %vm212_vm6 = vcmp.eq.f32.partialorder %v211_v40, 8.507059e+37 }
 0x13c   :  { %v309_v31 = vpop.eup %308 }
 0x13d   :  { %v311_v32 = vpop.eup %310  ;;  %v201_v34 = vadd.f32 1.0, %v309_v31 }
 0x13e   :  { %v203_v35 = vmul.f32 %v311_v32, %v200_v30  ;;  %vm208_vm2 = vweird.f32 %v311_v32 }
 0x13f   :  { %312 = vrcp.f32 %v201_v34  ;;  %vm209_vm5 = vmor %vm207_vm3, %vm208_vm2  ;;  %v228_v49 = vand.u32 2147483648, %v201_v34  ;;  %v226_v51 = vand.u32 2147483647, %v201_v34  ;;  %vm222_vm8 = vweird.f32 %v201_v34 }
 0x140   :  { %v204_v36 = vsub.f32 1.0, %v203_v35 }
 0x141   :  { %v229_v53 = vor.u32 1.1754944e-38, %v228_v49  ;;  %vm227_vm10 = vcmp.eq.f32.partialorder %v226_v51, 8.507059e+37 }
 0x142   :  { %v205_v39 = vmul.f32 %v311_v32, %v204_v36 }
 0x144   :  { %v206_v41 = vadd.f32 %v311_v32, %v205_v39 }
 0x145   :  { %v313_v42 = vpop.eup %312 }
 0x146   :  { %v210_v44 = vsel %vm209_vm5, %v311_v32, %v206_v41  ;;  %v218_v45 = vmul.f32 %v313_v42, %v201_v34  ;;  %vm223_vm7 = vweird.f32 %v313_v42 }
 0x147   :  { %v215_v46 = vsel %vm212_vm6, %v214_v43, %v210_v44  ;;  %vm224_vm9 = vmor %vm222_vm8, %vm223_vm7 }
 0x148   :  { %v232_v47 = vsel %vm193_vm4, %v215_v46, %v187_v24  ;;  %v219_v48 = vsub.f32 1.0, %v218_v45 }
 0x149   :  { %234 = vst [vmem:[#allocation9] sm:$0xff] %v232_v47 }
 0x14a   :  { %v220_v50 = vmul.f32 %v313_v42, %v219_v48 }
 0x14c   :  { %v221_v52 = vadd.f32 %v313_v42, %v220_v50 }
 0x14e   :  { %v225_v54 = vsel %vm224_vm9, %v313_v42, %v221_v52 }
 0x14f   :  { %v230_v55 = vsel %vm227_vm10, %v229_v53, %v225_v54 }
 0x150   :  { %v233_v56 = vsel %vm193_vm4, %v230_v55, %v189_v27 }
 0x151   :  { %235 = vst [vmem:[#allocation9 + $0x8] sm:$0xff] %v233_v56 }
 0x152   :  { %248 = dma.vmem_to_hbm [thread:$0]  %s241_s4, 256, %s243_s13, [#allocation5], %s423_s14, %s423_s14, %s424_s15  }
 0x153   :  { %414 = dma.done.wait [#allocation5], 256  }
 0x154   :  { %415 = vsyncadd [#allocation5], 4294967040 }
 0x155   :  { %253 = vsyncpa [#allocation4], 1 }
 0x156   :  { %254 = vsyncpa [#allocation7], 1 }
 0x157   :  { %255 = vsyncpa [#allocation5], 1 }

</bundles_post_ra>
